<compile_context>
chip_gen: v7x
topology: tpu7x:2x2x1
jax: 0.10.0
libtpu: 0.0.40
codegen_flags: <defaults>
</compile_context>

<pallas_src>
import functools

import jax
import jax.numpy as jnp
from jax.experimental import pallas as pl
from jax.experimental.pallas import tpu as pltpu


def _round_up(x, m):
    return ((x + m - 1) // m) * m


def tabular_mlp_kernel(x_ref,
                       w0_ref, b0_ref,
                       w1_ref, b1_ref, w2_ref, b2_ref,
                       wc_ref, bc_ref,
                       out_ref, *, depth):
    # BatchNorm is pre-folded into (w0, b0) on the host; first op is the matmul.
    h = jnp.maximum(
        jnp.dot(x_ref[...], w0_ref[...], preferred_element_type=jnp.float32)
        + b0_ref[...], 0.0)

    # depth x shared-weight ResidualBlock (dropout = identity in eval).
    # Static unroll: depth is a compile-time constant.
    for _ in range(depth):
        t = jnp.maximum(
            jnp.dot(h, w1_ref[...], preferred_element_type=jnp.float32)
            + b1_ref[...], 0.0)
        t = jnp.maximum(
            jnp.dot(t, w2_ref[...], preferred_element_type=jnp.float32)
            + b2_ref[...], 0.0)
        h = h + t

    # classifier -> lane-dense padded output (out_dim zero-padded to 128 lanes).
    out_ref[...] = (
        jnp.dot(h, wc_ref[...], preferred_element_type=jnp.float32) + bc_ref[...])


def tabular_net_forward(cat_meta, cont_meta, params, *, depth, b_tile=512):
    """cat_meta: [B, n_cat] int32, cont_meta: [B, n_cont] float32."""
    B = cat_meta.shape[0]

    # --- glue: embedding lookups (gather) + feature concat, plain JAX ---------
    # TODO(synk): fuse the embedding gather into the kernel (scalar-prefetch +
    # VMEM-resident tables) for production batch sizes; negligible at small B.
    emb_cols = [jnp.take(tbl, cat_meta[:, i], axis=0)
                for i, tbl in enumerate(params["emb_tables"])]
    cat_feat = (jnp.concatenate(emb_cols, axis=1) if emb_cols
                else jnp.zeros((B, 0), jnp.float32))
    x = jnp.concatenate([cat_feat, cont_meta.astype(jnp.float32)], axis=1)

    F = x.shape[1]
    H = params["w0"].shape[1]
    out_dim = params["wc"].shape[1]

    # --- fold eval-mode BatchNorm1d into the first Linear ----------------------
    eps = 1e-5
    bn_scale = params["bn_gamma"] / jnp.sqrt(params["bn_var"] + eps)
    bn_shift = params["bn_beta"] - params["bn_mean"] * bn_scale
    emb_out = cat_feat.shape[1]
    scale = jnp.concatenate([jnp.ones((emb_out,), jnp.float32), bn_scale])
    shift = jnp.concatenate([jnp.zeros((emb_out,), jnp.float32), bn_shift])
    w0 = scale[:, None] * params["w0"]                    # [F, H]
    b0 = params["b0"] + shift[None, :] @ params["w0"]     # [1, H]

    # --- pad to TPU-friendly shapes (zero padding is numerically inert) -------
    F_pad = _round_up(F, 8)          # sublane-friendly contraction dim for w0
    H_pad = _round_up(H, 128)        # lane-friendly hidden width
    O_pad = _round_up(out_dim, 128)  # lane-dense output store
    B_tile = min(b_tile, _round_up(B, 8))   # >=512 amortizes pipeline overhead
    B_pad = _round_up(B, B_tile)

    def pad2(a, rows, cols):
        return jnp.pad(a, ((0, rows - a.shape[0]), (0, cols - a.shape[1])))

    x_p = pad2(x, B_pad, F_pad)
    w0_p = pad2(w0, F_pad, H_pad)
    b0_p = pad2(b0, 1, H_pad)
    w1_p = pad2(params["w1"], H_pad, H_pad)
    b1_p = pad2(params["b1"], 1, H_pad)
    w2_p = pad2(params["w2"], H_pad, H_pad)
    b2_p = pad2(params["b2"], 1, H_pad)
    wc_p = pad2(params["wc"], H_pad, O_pad)
    bc_p = pad2(params["bc"], 1, O_pad)

    grid = (B_pad // B_tile,)
    fixed = lambda i: (0, 0)   # weights/biases: same block every step -> VMEM-resident

    flops = 2 * B_pad * (F_pad * H_pad + 2 * depth * H_pad * H_pad + H_pad * O_pad)
    bytes_accessed = 4 * (B_pad * F_pad + B_pad * O_pad
                          + F_pad * H_pad + 2 * H_pad * H_pad + H_pad * O_pad
                          + 3 * H_pad + O_pad)

    kernel = functools.partial(tabular_mlp_kernel, depth=depth)
    out_p = pl.pallas_call(
        kernel,
        out_shape=jax.ShapeDtypeStruct((B_pad, O_pad), jnp.float32),
        grid=grid,
        in_specs=[
            pl.BlockSpec((B_tile, F_pad), lambda i: (i, 0)),   # x: tiled over batch
            pl.BlockSpec((F_pad, H_pad), fixed),               # w0
            pl.BlockSpec((1, H_pad), fixed),                   # b0
            pl.BlockSpec((H_pad, H_pad), fixed),               # w1
            pl.BlockSpec((1, H_pad), fixed),                   # b1
            pl.BlockSpec((H_pad, H_pad), fixed),               # w2
            pl.BlockSpec((1, H_pad), fixed),                   # b2
            pl.BlockSpec((H_pad, O_pad), fixed),               # wc
            pl.BlockSpec((1, O_pad), fixed),                   # bc
        ],
        out_specs=pl.BlockSpec((B_tile, O_pad), lambda i: (i, 0)),
        compiler_params=pltpu.CompilerParams(
            dimension_semantics=("parallel",)),
        cost_estimate=pl.CostEstimate(
            flops=flops, transcendentals=0, bytes_accessed=bytes_accessed),
    )(x_p, w0_p, b0_p, w1_p, b1_p, w2_p, b2_p, wc_p, bc_p)

    return out_p[:B, :out_dim]


def init_params(key, categories, no_continuous, hidden_size, out_dim):
    emb_dims = [min(100, (c + 1) // 2) for c in categories]
    emb_out = sum(emb_dims)
    in_dim = emb_out + no_continuous

    keys = jax.random.split(key, 8 + len(categories))

    def lin(k, fan_in, fan_out):
        kw, kb = jax.random.split(k)
        bound = 1.0 / jnp.sqrt(fan_in)
        w = jax.random.uniform(kw, (fan_in, fan_out), jnp.float32, -bound, bound)
        b = jax.random.uniform(kb, (1, fan_out), jnp.float32, -bound, bound)
        return w, b

    emb_tables = [jax.random.normal(keys[i], (c, d), jnp.float32)
                  for i, (c, d) in enumerate(zip(categories, emb_dims))]
    o = len(categories)
    w0, b0 = lin(keys[o + 0], in_dim, hidden_size)
    w1, b1 = lin(keys[o + 1], hidden_size, hidden_size)   # ResidualBlock.linear1
    w2, b2 = lin(keys[o + 2], hidden_size, hidden_size)   # ResidualBlock.linear2
    wc, bc = lin(keys[o + 3], hidden_size, out_dim)       # classifier

    return dict(
        emb_tables=emb_tables,
        bn_gamma=jnp.ones((no_continuous,), jnp.float32),
        bn_beta=jnp.zeros((no_continuous,), jnp.float32),
        bn_mean=jnp.zeros((no_continuous,), jnp.float32),
        bn_var=jnp.ones((no_continuous,), jnp.float32),
        w0=w0, b0=b0, w1=w1, b1=b1, w2=w2, b2=b2, wc=wc, bc=bc,
    )


def _reference_forward(cat_meta, cont_meta, params, *, depth):
    """Pure-JAX reference for a correctness check."""
    emb = jnp.concatenate(
        [jnp.take(t, cat_meta[:, i], axis=0)
         for i, t in enumerate(params["emb_tables"])], axis=1)
    eps = 1e-5
    cont = (cont_meta - params["bn_mean"]) / jnp.sqrt(params["bn_var"] + eps)
    cont = cont * params["bn_gamma"] + params["bn_beta"]
    x = jnp.concatenate([emb, cont], axis=1)
    h = jnp.maximum(x @ params["w0"] + params["b0"], 0.0)
    for _ in range(depth):
        t = jnp.maximum(h @ params["w1"] + params["b1"], 0.0)
        t = jnp.maximum(t @ params["w2"] + params["b2"], 0.0)
        h = h + t
    return h @ params["wc"] + params["bc"]


if __name__ == "__main__":
    categories = (5, 7, 11)      # -> embedding dims (3, 4, 6), emb_out = 13
    no_continuous = 4
    hidden_size = 32
    out_dim = 3
    depth = 2
    B = 8

    key = jax.random.PRNGKey(0)
    k_param, k_cat, k_cont = jax.random.split(key, 3)
    params = init_params(k_param, categories, no_continuous, hidden_size, out_dim)

    cat_cols = [jax.random.randint(jax.random.fold_in(k_cat, i), (B, 1), 0, c,
                                   dtype=jnp.int32)
                for i, c in enumerate(categories)]
    cat_meta = jnp.concatenate(cat_cols, axis=1)            # [B, n_cat] int32
    cont_meta = jax.random.normal(k_cont, (B, no_continuous), jnp.float32)

    out = tabular_net_forward(cat_meta, cont_meta, params, depth=depth)
    out = jax.block_until_ready(out)

    ref = _reference_forward(cat_meta, cont_meta, params, depth=depth)
    assert out.shape == (B, out_dim)
    assert jnp.allclose(out, ref, rtol=1e-3, atol=1e-3), "mismatch vs JAX reference"

    print("KERNEL_OK")
</pallas_src>

<mosaic_0001>
module attributes {stable_mosaic.version = 11 : i64} {
  func.func @tabular_mlp_kernel(%arg0: i32, %arg1: memref<8x24xf32, #tpu.memory_space<vmem>>, %arg2: memref<24x128xf32, #tpu.memory_space<vmem>>, %arg3: memref<1x128xf32, #tpu.memory_space<vmem>>, %arg4: memref<128x128xf32, #tpu.memory_space<vmem>>, %arg5: memref<1x128xf32, #tpu.memory_space<vmem>>, %arg6: memref<128x128xf32, #tpu.memory_space<vmem>>, %arg7: memref<1x128xf32, #tpu.memory_space<vmem>>, %arg8: memref<128x128xf32, #tpu.memory_space<vmem>>, %arg9: memref<1x128xf32, #tpu.memory_space<vmem>>, %arg10: memref<8x128xf32, #tpu.memory_space<vmem>>) attributes {dimension_semantics = [#tpu.dimension_semantics<parallel>], iteration_bounds = array<i64: 1>, scalar_prefetch = 0 : i64, scratch_operands = 0 : i64, tpu.core_type = #tpu.core_type<tc>, window_params = [{transform_indices = @transform_0, window_bounds = array<i64: 8, 24>}, {pipeline_mode = #tpu.pipeline_mode<synchronous>, transform_indices = @transform_1, window_bounds = array<i64: 24, 128>}, {pipeline_mode = #tpu.pipeline_mode<synchronous>, transform_indices = @transform_2, window_bounds = array<i64: 1, 128>}, {pipeline_mode = #tpu.pipeline_mode<synchronous>, transform_indices = @transform_3, window_bounds = array<i64: 128, 128>}, {pipeline_mode = #tpu.pipeline_mode<synchronous>, transform_indices = @transform_4, window_bounds = array<i64: 1, 128>}, {pipeline_mode = #tpu.pipeline_mode<synchronous>, transform_indices = @transform_5, window_bounds = array<i64: 128, 128>}, {pipeline_mode = #tpu.pipeline_mode<synchronous>, transform_indices = @transform_6, window_bounds = array<i64: 1, 128>}, {pipeline_mode = #tpu.pipeline_mode<synchronous>, transform_indices = @transform_7, window_bounds = array<i64: 128, 128>}, {pipeline_mode = #tpu.pipeline_mode<synchronous>, transform_indices = @transform_8, window_bounds = array<i64: 1, 128>}, {transform_indices = @transform_9, window_bounds = array<i64: 8, 128>}]} {
    %c0 = arith.constant 0 : index
    %c0_0 = arith.constant 0 : index
    %0 = vector.load %arg1[%c0, %c0_0] : memref<8x24xf32, #tpu.memory_space<vmem>>, vector<8x24xf32>
    %c0_1 = arith.constant 0 : index
    %c0_2 = arith.constant 0 : index
    %1 = vector.load %arg2[%c0_1, %c0_2] : memref<24x128xf32, #tpu.memory_space<vmem>>, vector<24x128xf32>
    %cst = arith.constant dense<0.000000e+00> : vector<8x128xf32>
    %2 = tpu.matmul %0, %1, %cst {dimension_numbers = #tpu.dot_dimension_numbers<[1], [0], [0], [1], [0, 0, 1, 1], [], []>} : vector<8x24xf32>, vector<24x128xf32>, vector<8x128xf32> -> vector<8x128xf32>
    %c0_3 = arith.constant 0 : index
    %c0_4 = arith.constant 0 : index
    %3 = vector.load %arg3[%c0_3, %c0_4] : memref<1x128xf32, #tpu.memory_space<vmem>>, vector<1x128xf32>
    %4 = vector.broadcast %3 : vector<1x128xf32> to vector<8x128xf32>
    %5 = arith.addf %2, %4 : vector<8x128xf32>
    %cst_5 = arith.constant 0.000000e+00 : f32
    %6 = vector.broadcast %cst_5 : f32 to vector<8x128xf32>
    %7 = arith.maximumf %5, %6 : vector<8x128xf32>
    %c0_6 = arith.constant 0 : index
    %c0_7 = arith.constant 0 : index
    %8 = vector.load %arg4[%c0_6, %c0_7] : memref<128x128xf32, #tpu.memory_space<vmem>>, vector<128x128xf32>
    %cst_8 = arith.constant dense<0.000000e+00> : vector<8x128xf32>
    %9 = tpu.matmul %7, %8, %cst_8 {dimension_numbers = #tpu.dot_dimension_numbers<[1], [0], [0], [1], [0, 0, 1, 1], [], []>} : vector<8x128xf32>, vector<128x128xf32>, vector<8x128xf32> -> vector<8x128xf32>
    %c0_9 = arith.constant 0 : index
    %c0_10 = arith.constant 0 : index
    %10 = vector.load %arg5[%c0_9, %c0_10] : memref<1x128xf32, #tpu.memory_space<vmem>>, vector<1x128xf32>
    %11 = vector.broadcast %10 : vector<1x128xf32> to vector<8x128xf32>
    %12 = arith.addf %9, %11 : vector<8x128xf32>
    %cst_11 = arith.constant 0.000000e+00 : f32
    %13 = vector.broadcast %cst_11 : f32 to vector<8x128xf32>
    %14 = arith.maximumf %12, %13 : vector<8x128xf32>
    %c0_12 = arith.constant 0 : index
    %c0_13 = arith.constant 0 : index
    %15 = vector.load %arg6[%c0_12, %c0_13] : memref<128x128xf32, #tpu.memory_space<vmem>>, vector<128x128xf32>
    %cst_14 = arith.constant dense<0.000000e+00> : vector<8x128xf32>
    %16 = tpu.matmul %14, %15, %cst_14 {dimension_numbers = #tpu.dot_dimension_numbers<[1], [0], [0], [1], [0, 0, 1, 1], [], []>} : vector<8x128xf32>, vector<128x128xf32>, vector<8x128xf32> -> vector<8x128xf32>
    %c0_15 = arith.constant 0 : index
    %c0_16 = arith.constant 0 : index
    %17 = vector.load %arg7[%c0_15, %c0_16] : memref<1x128xf32, #tpu.memory_space<vmem>>, vector<1x128xf32>
    %18 = vector.broadcast %17 : vector<1x128xf32> to vector<8x128xf32>
    %19 = arith.addf %16, %18 : vector<8x128xf32>
    %cst_17 = arith.constant 0.000000e+00 : f32
    %20 = vector.broadcast %cst_17 : f32 to vector<8x128xf32>
    %21 = arith.maximumf %19, %20 : vector<8x128xf32>
    %22 = arith.addf %7, %21 : vector<8x128xf32>
    %c0_18 = arith.constant 0 : index
    %c0_19 = arith.constant 0 : index
    %23 = vector.load %arg4[%c0_18, %c0_19] : memref<128x128xf32, #tpu.memory_space<vmem>>, vector<128x128xf32>
    %cst_20 = arith.constant dense<0.000000e+00> : vector<8x128xf32>
    %24 = tpu.matmul %22, %23, %cst_20 {dimension_numbers = #tpu.dot_dimension_numbers<[1], [0], [0], [1], [0, 0, 1, 1], [], []>} : vector<8x128xf32>, vector<128x128xf32>, vector<8x128xf32> -> vector<8x128xf32>
    %c0_21 = arith.constant 0 : index
    %c0_22 = arith.constant 0 : index
    %25 = vector.load %arg5[%c0_21, %c0_22] : memref<1x128xf32, #tpu.memory_space<vmem>>, vector<1x128xf32>
    %26 = vector.broadcast %25 : vector<1x128xf32> to vector<8x128xf32>
    %27 = arith.addf %24, %26 : vector<8x128xf32>
    %cst_23 = arith.constant 0.000000e+00 : f32
    %28 = vector.broadcast %cst_23 : f32 to vector<8x128xf32>
    %29 = arith.maximumf %27, %28 : vector<8x128xf32>
    %c0_24 = arith.constant 0 : index
    %c0_25 = arith.constant 0 : index
    %30 = vector.load %arg6[%c0_24, %c0_25] : memref<128x128xf32, #tpu.memory_space<vmem>>, vector<128x128xf32>
    %cst_26 = arith.constant dense<0.000000e+00> : vector<8x128xf32>
    %31 = tpu.matmul %29, %30, %cst_26 {dimension_numbers = #tpu.dot_dimension_numbers<[1], [0], [0], [1], [0, 0, 1, 1], [], []>} : vector<8x128xf32>, vector<128x128xf32>, vector<8x128xf32> -> vector<8x128xf32>
    %c0_27 = arith.constant 0 : index
    %c0_28 = arith.constant 0 : index
    %32 = vector.load %arg7[%c0_27, %c0_28] : memref<1x128xf32, #tpu.memory_space<vmem>>, vector<1x128xf32>
    %33 = vector.broadcast %32 : vector<1x128xf32> to vector<8x128xf32>
    %34 = arith.addf %31, %33 : vector<8x128xf32>
    %cst_29 = arith.constant 0.000000e+00 : f32
    %35 = vector.broadcast %cst_29 : f32 to vector<8x128xf32>
    %36 = arith.maximumf %34, %35 : vector<8x128xf32>
    %37 = arith.addf %22, %36 : vector<8x128xf32>
    %c0_30 = arith.constant 0 : index
    %c0_31 = arith.constant 0 : index
    %38 = vector.load %arg8[%c0_30, %c0_31] : memref<128x128xf32, #tpu.memory_space<vmem>>, vector<128x128xf32>
    %cst_32 = arith.constant dense<0.000000e+00> : vector<8x128xf32>
    %39 = tpu.matmul %37, %38, %cst_32 {dimension_numbers = #tpu.dot_dimension_numbers<[1], [0], [0], [1], [0, 0, 1, 1], [], []>} : vector<8x128xf32>, vector<128x128xf32>, vector<8x128xf32> -> vector<8x128xf32>
    %c0_33 = arith.constant 0 : index
    %c0_34 = arith.constant 0 : index
    %40 = vector.load %arg9[%c0_33, %c0_34] : memref<1x128xf32, #tpu.memory_space<vmem>>, vector<1x128xf32>
    %41 = vector.broadcast %40 : vector<1x128xf32> to vector<8x128xf32>
    %42 = arith.addf %39, %41 : vector<8x128xf32>
    %c0_35 = arith.constant 0 : index
    %c0_36 = arith.constant 0 : index
    %43 = vector.load %arg10[%c0_35, %c0_36] : memref<8x128xf32, #tpu.memory_space<vmem>>, vector<8x128xf32>
    tpu.vector_store %arg10[%c0_35, %c0_36], %42 {strides = array<i32>} : memref<8x128xf32, #tpu.memory_space<vmem>>, vector<8x128xf32>,
    return
  }
  func.func @transform_0(%arg0: i32) -> (i32, i32) {
    %c0_i32 = arith.constant 0 : i32
    %c0_i32_0 = arith.constant 0 : i32
    return %arg0, %c0_i32 : i32, i32
  }
  func.func @transform_1(%arg0: i32) -> (i32, i32) {
    %c0_i32 = arith.constant 0 : i32
    %c0_i32_0 = arith.constant 0 : i32
    %c0_i32_1 = arith.constant 0 : i32
    return %c0_i32, %c0_i32_0 : i32, i32
  }
  func.func @transform_2(%arg0: i32) -> (i32, i32) {
    %c0_i32 = arith.constant 0 : i32
    %c0_i32_0 = arith.constant 0 : i32
    %c0_i32_1 = arith.constant 0 : i32
    return %c0_i32, %c0_i32_0 : i32, i32
  }
  func.func @transform_3(%arg0: i32) -> (i32, i32) {
    %c0_i32 = arith.constant 0 : i32
    %c0_i32_0 = arith.constant 0 : i32
    %c0_i32_1 = arith.constant 0 : i32
    return %c0_i32, %c0_i32_0 : i32, i32
  }
  func.func @transform_4(%arg0: i32) -> (i32, i32) {
    %c0_i32 = arith.constant 0 : i32
    %c0_i32_0 = arith.constant 0 : i32
    %c0_i32_1 = arith.constant 0 : i32
    return %c0_i32, %c0_i32_0 : i32, i32
  }
  func.func @transform_5(%arg0: i32) -> (i32, i32) {
    %c0_i32 = arith.constant 0 : i32
    %c0_i32_0 = arith.constant 0 : i32
    %c0_i32_1 = arith.constant 0 : i32
    return %c0_i32, %c0_i32_0 : i32, i32
  }
  func.func @transform_6(%arg0: i32) -> (i32, i32) {
    %c0_i32 = arith.constant 0 : i32
    %c0_i32_0 = arith.constant 0 : i32
    %c0_i32_1 = arith.constant 0 : i32
    return %c0_i32, %c0_i32_0 : i32, i32
  }
  func.func @transform_7(%arg0: i32) -> (i32, i32) {
    %c0_i32 = arith.constant 0 : i32
    %c0_i32_0 = arith.constant 0 : i32
    %c0_i32_1 = arith.constant 0 : i32
    return %c0_i32, %c0_i32_0 : i32, i32
  }
  func.func @transform_8(%arg0: i32) -> (i32, i32) {
    %c0_i32 = arith.constant 0 : i32
    %c0_i32_0 = arith.constant 0 : i32
    %c0_i32_1 = arith.constant 0 : i32
    return %c0_i32, %c0_i32_0 : i32, i32
  }
  func.func @transform_9(%arg0: i32) -> (i32, i32) {
    %c0_i32 = arith.constant 0 : i32
    %c0_i32_0 = arith.constant 0 : i32
    return %arg0, %c0_i32 : i32, i32
  }
}

</mosaic_0001>

<bundles_post_ra>
// kernel: tpu_custom_call.1
= control target key start
LH: loop header
LB: loop body
LE: loop exit
PB: predicated region body
PF: predicated region fallthrough
CT: control target
= control target key end

     0   :  { %14 = vsyncpa [#allocation3], 0  ;;  %s1423_s0 = inlined_call_operand.hbm [shape: f32[8,24], index: 0, kind: input, shape index: {}]   ;;  %s1424_s1 = inlined_call_operand.hbm [shape: f32[24,128], index: 1, kind: input, shape index: {}]   ;;  %s1425_s2 = inlined_call_operand.vmem [shape: f32[1,128], index: 2, kind: input, shape index: {}]   ;;  %s1426_s3 = inlined_call_operand.hbm [shape: f32[128,128], index: 3, kind: input, shape index: {}]   ;;  %s1427_s4 = inlined_call_operand.vmem [shape: f32[1,128], index: 4, kind: input, shape index: {}]   ;;  %s1428_s5 = inlined_call_operand.hbm [shape: f32[128,128], index: 5, kind: input, shape index: {}]   ;;  %s1429_s6 = inlined_call_operand.vmem [shape: f32[1,128], index: 6, kind: input, shape index: {}]   ;;  %s1430_s7 = inlined_call_operand.hbm [shape: f32[128,128], index: 7, kind: input, shape index: {}]   ;;  %s1431_s8 = inlined_call_operand.vmem [shape: f32[1,128], index: 8, kind: input, shape index: {}]   ;;  %s1432_s9 = inlined_call_operand.hbm [shape: f32[8,128], index: 9, kind: output, shape index: {}]  }
   0x1   :  { %15 = vsyncpa [#allocation6], 0 }
   0x2   :  { %16 = vsyncpa [#allocation9], 0 }
   0x3   :  { %17 = vsyncpa [#allocation4], 0  ;;  %s1180_s30 = smov [#allocation5]   ;;  %s1040_s13 = scalar_lea.hbm %s1424_s1, 384 }
   0x4   :  { %s33_s10 = sshll.u32 %s1180_s30, 4  ;;  %p1041_p0 = scmp.ne.s32.totalorder %s1424_s1, %s1040_s13  ;;  %s34_s10 = int_to_ptr.vmem [resolvable:$true] %s33_s10 }
   0x5   :  { %p1044_p1 = scmp.lt.u32.totalorder %s1040_s13, %s1424_s1 }
   0x7   :  { %p1046_p2 = pnand %p1044_p1, %p1041_p0 }
   0x9   :  { %1049 = shalt.err (!%p1046_p2)
}
   0xa   :  { %s1050_s18 = scalar_lea.vmem %s34_s10, 384  ;;  %p1055_p4 = scmp.lt.s32.totalorder %s34_s10, %s34_s10 }
   0xb   :  { %p1051_p3 = scmp.ne.s32.totalorder %s34_s10, %s1050_s18  ;;  %p1056_p5 = scmp.lt.s32.totalorder %s1050_s18, %s1050_s18 }
   0xd   :  { %p1057_p6 = por %p1056_p5, %p1055_p4 }
   0xf   :  { %p1058_p7 = pnand %p1057_p6, %p1051_p3 }
  0x11   :  { %1061 = shalt.err (!%p1058_p7)
}
  0x12   :  { %s1181_s19 = smov 128   ;;  %s1182_s20 = smov 8  }
  0x13   :  { %39 = dma.hbm_to_vmem [thread:$0]  %s1424_s1, 384, %s34_s10, [#allocation6], %s1181_s19, %s1181_s19, %s1182_s20  }
  0x14   :  { %s1183_s23 = smov [#allocation8]   ;;  %s1184_s25 = smov [#allocation2]  }
  0x15   :  { %s61_s24 = sshll.u32 %s1183_s23, 4  ;;  %s24_s26 = sshll.u32 %s1184_s25, 4  ;;  %s62_s24 = int_to_ptr.vmem [resolvable:$true] %s61_s24  ;;  %s25_s26 = int_to_ptr.vmem [resolvable:$true] %s24_s26 }
  0x16   :  { %s1062_s29 = scalar_lea.hbm %s1428_s5, 2048 }
  0x17   :  { %p1063_p8 = scmp.ne.s32.totalorder %s1428_s5, %s1062_s29  ;;  %p1066_p9 = scmp.lt.u32.totalorder %s1062_s29, %s1428_s5 }
  0x19   :  { %p1068_p10 = pnand %p1066_p9, %p1063_p8 }
  0x1b   :  { %1071 = shalt.err (!%p1068_p10)
}
  0x1c   :  { %s1072_s1 = scalar_lea.vmem %s62_s24, 2048  ;;  %p1077_p12 = scmp.lt.s32.totalorder %s62_s24, %s62_s24 }
  0x1d   :  { %p1073_p11 = scmp.ne.s32.totalorder %s62_s24, %s1072_s1  ;;  %p1078_p13 = scmp.lt.s32.totalorder %s1072_s1, %s1072_s1 }
  0x1f   :  { %p1079_p0 = por %p1078_p13, %p1077_p12 }
  0x21   :  { %p1080_p1 = pnand %p1079_p0, %p1073_p11 }
  0x23   :  { %1083 = shalt.err (!%p1080_p1)
}
  0x24   :  { %67 = dma.hbm_to_vmem [thread:$0]  %s1428_s5, 2048, %s62_s24, [#allocation9], %s1181_s19, %s1181_s19, %s1182_s20  }
  0x25   :  { %s1084_s17 = scalar_lea.hbm %s1423_s0, 128 }
  0x26   :  { %p1085_p2 = scmp.ne.s32.totalorder %s1423_s0, %s1084_s17  ;;  %p1088_p3 = scmp.lt.u32.totalorder %s1084_s17, %s1423_s0 }
  0x28   :  { %p1090_p4 = pnand %p1088_p3, %p1085_p2 }
  0x2a   :  { %1093 = shalt.err (!%p1090_p4)
}
  0x2b   :  { %s1094_s25 = scalar_lea.vmem %s25_s26, 128  ;;  %p1099_p6 = scmp.lt.s32.totalorder %s25_s26, %s25_s26 }
  0x2c   :  { %p1095_p5 = scmp.ne.s32.totalorder %s25_s26, %s1094_s25  ;;  %p1100_p7 = scmp.lt.s32.totalorder %s1094_s25, %s1094_s25 }
  0x2e   :  { %p1101_p8 = por %p1100_p7, %p1099_p6 }
  0x30   :  { %p1102_p9 = pnand %p1101_p8, %p1095_p5 }
  0x32   :  { %1105 = shalt.err (!%p1102_p9)
}
  0x33   :  { %27 = dma.hbm_to_vmem [thread:$0]  %s1423_s0, 128, %s25_s26, [#allocation3]  }
  0x34   :  { %s1185_s27 = smov [#allocation7]   ;;  %s1186_s29 = smov [#allocation10]  }
  0x35   :  { %s47_s28 = sshll.u32 %s1185_s27, 4  ;;  %s75_s30 = sshll.u32 %s1186_s29, 4  ;;  %s48_s28 = int_to_ptr.vmem [resolvable:$true] %s47_s28  ;;  %s76_s30 = int_to_ptr.vmem [resolvable:$true] %s75_s30 }
  0x36   :  { %s1106_s13 = scalar_lea.hbm %s1426_s3, 2048 }
  0x37   :  { %p1107_p10 = scmp.ne.s32.totalorder %s1426_s3, %s1106_s13  ;;  %p1110_p11 = scmp.lt.u32.totalorder %s1106_s13, %s1426_s3 }
  0x39   :  { %p1112_p12 = pnand %p1110_p11, %p1107_p10 }
  0x3b   :  { %1115 = shalt.err (!%p1112_p12)
}
  0x3c   :  { %s1116_s0 = scalar_lea.vmem %s48_s28, 2048  ;;  %p1121_p0 = scmp.lt.s32.totalorder %s48_s28, %s48_s28 }
  0x3d   :  { %p1117_p13 = scmp.ne.s32.totalorder %s48_s28, %s1116_s0  ;;  %p1122_p1 = scmp.lt.s32.totalorder %s1116_s0, %s1116_s0 }
  0x3f   :  { %p1123_p2 = por %p1122_p1, %p1121_p0 }
  0x41   :  { %p1124_p3 = pnand %p1123_p2, %p1117_p13 }
  0x43   :  { %1127 = shalt.err (!%p1124_p3)
}
  0x44   :  { %53 = dma.hbm_to_vmem [thread:$0]  %s1426_s3, 2048, %s48_s28, [#allocation6], %s1181_s19, %s1181_s19, %s1182_s20  }
  0x45   :  { %s1128_s21 = scalar_lea.hbm %s1430_s7, 2048 }
  0x46   :  { %p1129_p4 = scmp.ne.s32.totalorder %s1430_s7, %s1128_s21  ;;  %p1132_p5 = scmp.lt.u32.totalorder %s1128_s21, %s1430_s7 }
  0x48   :  { %p1134_p6 = pnand %p1132_p5, %p1129_p4 }
  0x4a   :  { %1137 = shalt.err (!%p1134_p6)
}
  0x4b   :  { %s1138_s24 = scalar_lea.vmem %s76_s30, 2048  ;;  %p1143_p8 = scmp.lt.s32.totalorder %s76_s30, %s76_s30 }
  0x4c   :  { %p1139_p7 = scmp.ne.s32.totalorder %s76_s30, %s1138_s24  ;;  %p1144_p9 = scmp.lt.s32.totalorder %s1138_s24, %s1138_s24 }
  0x4e   :  { %p1145_p10 = por %p1144_p9, %p1143_p8 }
  0x50   :  { %p1146_p11 = pnand %p1145_p10, %p1139_p7 }
  0x52   :  { %1149 = shalt.err (!%p1146_p11)
}
  0x53   :  { %81 = dma.hbm_to_vmem [thread:$0]  %s1430_s7, 2048, %s76_s30, [#allocation9], %s1181_s19, %s1181_s19, %s1182_s20  }
  0x54   :  { %1172 = dma.done.wait [#allocation3], 128  }
  0x55   :  { %1173 = vsyncadd [#allocation3], 4294967168 }
  0x56   :  { %1174 = dma.done.wait [#allocation6], 2432  }
  0x57   :  { %1175 = vsyncadd [#allocation6], 4294964864 }
  0x58   :  { %1176 = dma.done.wait [#allocation9], 4096  }
  0x59   :  { %1177 = vsyncadd [#allocation9], 4294963200  ;;  %v1187_v0 = vmov 0.0|0.0   ;;  %vm1188_vm0 = vmmov 0   ;;  %v1189_v1 = vmov 0.0   ;;  %v100_v2 = vld [vmem:[#allocation5] sm:$0xff] }
  0x5a   :  { %906 = vmatprep.subr.bf16.mxu0 %v1187_v0  ;;  %728 = vmatprep.mubr.msk.f32.mxu0 %vm1188_vm0, %v1189_v1  ;;  %v101_v3 = vld [vmem:[#allocation5 + $0x8] sm:$0xff]  ;;  %v185_v5 = vld [vmem:[#allocation7] sm:$0xff]  ;;  %v186_v6 = vld [vmem:[#allocation7 + $0x8] sm:$0xff]  ;;  %vm110_vm1 = vcmask 195584   ;;  %s1190_s30 = smov [#allocation11]  }
  0x5b   :  { %909 = vmatprep.subr.bf16.mxu1 %v1187_v0  ;;  %763 = vmatprep.mubr.msk.f32.mxu1 %vm1188_vm0, %v1189_v1  ;;  %v907_v4 = vpack.c.bf16 %v101_v3, %v100_v2  ;;  %v1319_v7 = vpack.c.bf16 %v186_v6, %v185_v5  ;;  %v187_v8 = vld [vmem:[#allocation7 + $0x10] sm:$0xff]  ;;  %v188_v9 = vld [vmem:[#allocation7 + $0x18] sm:$0xff]  ;;  %v99_v12 = vld [vmem:[#allocation2] sm:$0xff]  ;;  %s617_s11 = sshll.u32 %s1190_s30, 4  ;;  %s618_s11 = int_to_ptr.vmem [resolvable:$true] %s617_s11 }
  0x5c   :  { %v102_v10 = vld [vmem:[#allocation5 + $0x10] sm:$0xff]  ;;  %v1323_v11 = vpack.c.bf16 %v188_v9, %v187_v8  ;;  %v189_v13 = vld [vmem:[#allocation7 + $0x20] sm:$0xff]  ;;  %v190_v14 = vld [vmem:[#allocation7 + $0x28] sm:$0xff]  ;;  %s1150_s12 = scalar_lea.vmem %s618_s11, 128  ;;  %p1155_p13 = scmp.lt.s32.totalorder %s618_s11, %s618_s11 }
  0x5d   :  { %908 = vmatpush3.bf16.msra.mxu0 %v907_v4  ;;  %911 = vmatpush3.bf16.msra.mxu1 %v1319_v7  ;;  %v1327_v15 = vpack.c.bf16 %v190_v14, %v189_v13  ;;  %v191_v16 = vld [vmem:[#allocation7 + $0x30] sm:$0xff]  ;;  %v192_v17 = vld [vmem:[#allocation7 + $0x38] sm:$0xff]  ;;  %v193_v19 = vld [vmem:[#allocation7 + $0x40] sm:$0xff]  ;;  %p1151_p12 = scmp.ne.s32.totalorder %s618_s11, %s1150_s12  ;;  %p1156_p0 = scmp.lt.s32.totalorder %s1150_s12, %s1150_s12 }
  0x5e   :  { %726 = vmatprep.subr.mxu0 %v1189_v1  ;;  %912 = vmatprep.subr.bf16.mxu1 %v1187_v0  ;;  %v1334_v18 = vpack.c.bf16 %v192_v17, %v191_v16  ;;  %v194_v20 = vld [vmem:[#allocation7 + $0x48] sm:$0xff]  ;;  %v195_v22 = vld [vmem:[#allocation7 + $0x50] sm:$0xff]  ;;  %v196_v23 = vld [vmem:[#allocation7 + $0x58] sm:$0xff] }
  0x5f   :  { %v1338_v21 = vpack.c.bf16 %v194_v20, %v193_v19  ;;  %v1342_v24 = vpack.c.bf16 %v196_v23, %v195_v22  ;;  %v197_v25 = vld [vmem:[#allocation7 + $0x60] sm:$0xff]  ;;  %v198_v26 = vld [vmem:[#allocation7 + $0x68] sm:$0xff]  ;;  %v199_v28 = vld [vmem:[#allocation7 + $0x70] sm:$0xff]  ;;  %p1157_p1 = por %p1156_p0, %p1155_p13 }
  0x60   :  { %v928_v27 = vpack.c.bf16 %v198_v26, %v197_v25  ;;  %v200_v29 = vld [vmem:[#allocation7 + $0x78] sm:$0xff]  ;;  %v279_v31 = vld [vmem:[#allocation8] sm:$0xff]  ;;  %v280_v32 = vld [vmem:[#allocation8 + $0x8] sm:$0xff] }
  0x61   :  { %727 = vmatpush3.msra.mxu0 %v102_v10  ;;  %914 = vmatpush3.bf16.msra.mxu1 %v1323_v11  ;;  %v931_v30 = vpack.c.bf16 %v200_v29, %v199_v28  ;;  %v281_v33 = vld [vmem:[#allocation8 + $0x10] sm:$0xff]  ;;  %v1349_v34 = vpack.c.bf16 %v280_v32, %v279_v31  ;;  %v282_v35 = vld [vmem:[#allocation8 + $0x18] sm:$0xff]  ;;  %v283_v37 = vld [vmem:[#allocation8 + $0x20] sm:$0xff]  ;;  %p1158_p2 = pnand %p1157_p1, %p1151_p12 }
  0x62   :  { %729 = vmatmul.mubr.msk.f32.vlgmr.msra.gmra.mrb[0].mxu0 %vm110_vm1, %v99_v12  ;;  %915 = vmatprep.subr.bf16.mxu1 %v1187_v0  ;;  %v1352_v36 = vpack.c.bf16 %v282_v35, %v281_v33  ;;  %v284_v38 = vld [vmem:[#allocation8 + $0x28] sm:$0xff]  ;;  %v285_v40 = vld [vmem:[#allocation8 + $0x30] sm:$0xff]  ;;  %v286_v41 = vld [vmem:[#allocation8 + $0x38] sm:$0xff] }
  0x63   :  { %933 = vmatprep.subr.bf16.mxu0 %v1187_v0  ;;  %798 = vmatprep.mubr.msk.f32.mxu0 %vm1188_vm0, %v1189_v1  ;;  %v940_v39 = vpack.c.bf16 %v284_v38, %v283_v37  ;;  %v943_v42 = vpack.c.bf16 %v286_v41, %v285_v40  ;;  %v287_v43 = vld [vmem:[#allocation8 + $0x40] sm:$0xff]  ;;  %v288_v44 = vld [vmem:[#allocation8 + $0x48] sm:$0xff]  ;;  %v289_v46 = vld [vmem:[#allocation8 + $0x50] sm:$0xff] }
  0x64   :  { %935 = vmatpush3.bf16.msra.mxu0 %v1349_v34  ;;  %v946_v45 = vpack.c.bf16 %v288_v44, %v287_v43  ;;  %v290_v47 = vld [vmem:[#allocation8 + $0x58] sm:$0xff]  ;;  %v291_v49 = vld [vmem:[#allocation8 + $0x60] sm:$0xff]  ;;  %v292_v50 = vld [vmem:[#allocation8 + $0x68] sm:$0xff] }
  0x65   :  { %917 = vmatpush3.bf16.msra.mxu1 %v1327_v15  ;;  %936 = vmatprep.subr.bf16.mxu0 %v1187_v0  ;;  %v949_v48 = vpack.c.bf16 %v290_v47, %v289_v46  ;;  %v952_v51 = vpack.c.bf16 %v292_v50, %v291_v49  ;;  %v628_v52 = vld [vmem:[%s1425_s2] ss:$0 sm:$0xff]  ;;  %v293_v57 = vld [vmem:[#allocation8 + $0x70] sm:$0xff]  ;;  %v294_v58 = vld [vmem:[#allocation8 + $0x78] sm:$0xff] }
  0x66   :  { %918 = vmatprep.subr.bf16.mxu1 %v1187_v0  ;;  %v955_v59 = vpack.c.bf16 %v294_v58, %v293_v57  ;;  %v630_v60 = vld [vmem:[%s1427_s4] ss:$0 sm:$0xff]  ;;  %v518_v10 = vld [vmem:[#allocation10 + $0x8] sm:$0xff]  ;;  %v520_v13 = vld [vmem:[#allocation10 + $0x18] sm:$0xff] }
  0x67   :  { %v631_v3 = vld [vmem:[%s1429_s6] ss:$0 sm:$0xff]  ;;  %v522_v16 = vld [vmem:[#allocation10 + $0x28] sm:$0xff]  ;;  %v524_v19 = vld [vmem:[#allocation10 + $0x38] sm:$0xff] }
  0x68   :  { %938 = vmatpush3.bf16.msra.mxu0 %v1352_v36  ;;  %v517_v9 = vld [vmem:[#allocation10] sm:$0xff]  ;;  %v527_v23 = vld [vmem:[#allocation10 + $0x50] sm:$0xff]  ;;  %v530_v31 = vld [vmem:[#allocation10 + $0x68] sm:$0xff] }
  0x69   :  { %920 = vmatpush3.bf16.msra.mxu1 %v1334_v18  ;;  %939 = vmatprep.subr.bf16.mxu0 %v1187_v0  ;;  %v1006_v12 = vpack.c.bf16 %v518_v10, %v517_v9  ;;  %v531_v33 = vld [vmem:[#allocation10 + $0x70] sm:$0xff]  ;;  %v632_v41 = vld [vmem:[%s1431_s8] ss:$0 sm:$0xff] }
  0x6a   :  { %921 = vmatprep.subr.bf16.mxu1 %v1187_v0 }
  0x6c   :  { %941 = vmatpush3.bf16.msra.mxu0 %v940_v39 }
  0x6d   :  { %923 = vmatpush3.bf16.msra.mxu1 %v1338_v21  ;;  %942 = vmatprep.subr.bf16.mxu0 %v1187_v0 }
  0x6e   :  { %924 = vmatprep.subr.bf16.mxu1 %v1187_v0 }
  0x70   :  { %944 = vmatpush3.bf16.msra.mxu0 %v943_v42 }
  0x71   :  { %926 = vmatpush3.bf16.msra.mxu1 %v1342_v24  ;;  %945 = vmatprep.subr.bf16.mxu0 %v1187_v0 }
  0x72   :  { %927 = vmatprep.subr.bf16.mxu1 %v1187_v0 }
  0x74   :  { %947 = vmatpush3.bf16.msra.mxu0 %v946_v45 }
  0x75   :  { %929 = vmatpush3.bf16.msra.mxu1 %v928_v27  ;;  %948 = vmatprep.subr.bf16.mxu0 %v1187_v0 }
  0x76   :  { %930 = vmatprep.subr.bf16.mxu1 %v1187_v0 }
  0x78   :  { %950 = vmatpush3.bf16.msra.mxu0 %v949_v48 }
  0x79   :  { %932 = vmatpush3.bf16.msra.mxu1 %v931_v30  ;;  %951 = vmatprep.subr.bf16.mxu0 %v1187_v0 }
  0x7a   :  { %957 = vmatprep.subr.bf16.mxu1 %v1187_v0 }
  0x7c   :  { %953 = vmatpush3.bf16.msra.mxu0 %v952_v51 }
  0x7d   :  { %954 = vmatprep.subr.bf16.mxu0 %v1187_v0 }
  0x80   :  { %956 = vmatpush3.bf16.msra.mxu0 %v955_v59 }
  0x81   :  { %981 = vmatprep.subr.bf16.mxu0 %v1187_v0 }
 0x135   :  { %v180_v53 = vpop.f32.mrb[0].mxu0 }
 0x136   :  { %v181_v54 = vadd.f32 %v628_v52, %v180_v53  ;;  %v730_v55 = vpop.f32.mrb[1].mxu0 }
 0x138   :  { %v184_v56 = vmax.f32 %v181_v54, 0.0 }
 0x13a   :  { %764 = vmatmul.mubr.f32.vlgmr.msra.gmra.mrb[0].mxu1 %v184_v56 }
 0x13b   :  { %959 = vmatpush3.bf16.msra.mxu1 %v1319_v7  ;;  %833 = vmatprep.mubr.msk.f32.mxu1 %vm1188_vm0, %v1189_v1 }
 0x13c   :  { %960 = vmatprep.subr.bf16.mxu1 %v1187_v0 }
 0x13f   :  { %962 = vmatpush3.bf16.msra.mxu1 %v1323_v11  ;;  %v519_v11 = vld [vmem:[#allocation10 + $0x10] sm:$0xff] }
 0x140   :  { %963 = vmatprep.subr.bf16.mxu1 %v1187_v0  ;;  %v1009_v14 = vpack.c.bf16 %v520_v13, %v519_v11 }
 0x143   :  { %965 = vmatpush3.bf16.msra.mxu1 %v1327_v15  ;;  %v521_v15 = vld [vmem:[#allocation10 + $0x20] sm:$0xff] }
 0x144   :  { %966 = vmatprep.subr.bf16.mxu1 %v1187_v0  ;;  %v1012_v17 = vpack.c.bf16 %v522_v16, %v521_v15 }
 0x147   :  { %968 = vmatpush3.bf16.msra.mxu1 %v1334_v18  ;;  %v523_v18 = vld [vmem:[#allocation10 + $0x30] sm:$0xff] }
 0x148   :  { %969 = vmatprep.subr.bf16.mxu1 %v1187_v0  ;;  %v1015_v20 = vpack.c.bf16 %v524_v19, %v523_v18 }
 0x14b   :  { %971 = vmatpush3.bf16.msra.mxu1 %v1338_v21  ;;  %v526_v21 = vld [vmem:[#allocation10 + $0x48] sm:$0xff] }
 0x14c   :  { %972 = vmatprep.subr.bf16.mxu1 %v1187_v0 }
 0x14f   :  { %974 = vmatpush3.bf16.msra.mxu1 %v1342_v24  ;;  %v528_v24 = vld [vmem:[#allocation10 + $0x58] sm:$0xff] }
 0x150   :  { %975 = vmatprep.subr.bf16.mxu1 %v1187_v0  ;;  %v1021_v25 = vpack.c.bf16 %v528_v24, %v527_v23 }
 0x153   :  { %977 = vmatpush3.bf16.msra.mxu1 %v928_v27 }
 0x154   :  { %978 = vmatprep.subr.bf16.mxu1 %v1187_v0 }
 0x157   :  { %980 = vmatpush3.bf16.msra.mxu1 %v931_v30  ;;  %v529_v30 = vld [vmem:[#allocation10 + $0x60] sm:$0xff] }
 0x158   :  { %1005 = vmatprep.subr.bf16.mxu1 %v1187_v0  ;;  %v1024_v32 = vpack.c.bf16 %v530_v31, %v529_v30 }
 0x20d   :  { %v274_v61 = vpop.f32.mrb[0].mxu1 }
 0x20e   :  { %v275_v62 = vadd.f32 %v630_v60, %v274_v61  ;;  %v765_v63 = vpop.f32.mrb[1].mxu1 }
 0x210   :  { %v278_v2 = vmax.f32 %v275_v62, 0.0 }
 0x212   :  { %799 = vmatmul.mubr.f32.vlgmr.msra.gmra.mrb[2].mxu0 %v278_v2 }
 0x213   :  { %983 = vmatpush3.bf16.msra.mxu0 %v1349_v34  ;;  %868 = vmatprep.mubr.msk.f32.mxu0 %vm1188_vm0, %v1189_v1  ;;  %v532_v34 = vld [vmem:[#allocation10 + $0x78] sm:$0xff] }
 0x214   :  { %984 = vmatprep.subr.bf16.mxu0 %v1187_v0  ;;  %v1027_v35 = vpack.c.bf16 %v532_v34, %v531_v33 }
 0x217   :  { %986 = vmatpush3.bf16.msra.mxu0 %v1352_v36 }
 0x218   :  { %987 = vmatprep.subr.bf16.mxu0 %v1187_v0 }
 0x21b   :  { %989 = vmatpush3.bf16.msra.mxu0 %v940_v39 }
 0x21c   :  { %990 = vmatprep.subr.bf16.mxu0 %v1187_v0 }
 0x21f   :  { %992 = vmatpush3.bf16.msra.mxu0 %v943_v42 }
 0x220   :  { %993 = vmatprep.subr.bf16.mxu0 %v1187_v0 }
 0x223   :  { %995 = vmatpush3.bf16.msra.mxu0 %v946_v45 }
 0x224   :  { %996 = vmatprep.subr.bf16.mxu0 %v1187_v0 }
 0x227   :  { %998 = vmatpush3.bf16.msra.mxu0 %v949_v48 }
 0x228   :  { %999 = vmatprep.subr.bf16.mxu0 %v1187_v0 }
 0x22b   :  { %1001 = vmatpush3.bf16.msra.mxu0 %v952_v51 }
 0x22c   :  { %1002 = vmatprep.subr.bf16.mxu0 %v1187_v0 }
 0x22f   :  { %1004 = vmatpush3.bf16.msra.mxu0 %v955_v59 }
 0x2e5   :  { %v368_v4 = vpop.f32.mrb[2].mxu0 }
 0x2e6   :  { %v369_v5 = vadd.f32 %v631_v3, %v368_v4  ;;  %v800_v6 = vpop.f32.mrb[3].mxu0 }
 0x2e8   :  { %v372_v7 = vmax.f32 %v369_v5, 0.0 }
 0x2ea   :  { %v373_v8 = vadd.f32 %v372_v7, %v184_v56 }
 0x2ec   :  { %834 = vmatmul.mubr.f32.vlgmr.msra.gmra.mrb[2].mxu1 %v373_v8 }
 0x2ed   :  { %903 = vmatprep.mubr.msk.f32.mxu1 %vm1188_vm0, %v1189_v1  ;;  %1007 = vmatpush3.bf16.msra.mxu1 %v1006_v12  ;;  %v525_v1 = vld [vmem:[#allocation10 + $0x40] sm:$0xff] }
 0x2ee   :  { %1008 = vmatprep.subr.bf16.mxu1 %v1187_v0  ;;  %v1018_v22 = vpack.c.bf16 %v526_v21, %v525_v1 }
 0x2f1   :  { %1010 = vmatpush3.bf16.msra.mxu1 %v1009_v14 }
 0x2f2   :  { %1011 = vmatprep.subr.bf16.mxu1 %v1187_v0 }
 0x2f5   :  { %1013 = vmatpush3.bf16.msra.mxu1 %v1012_v17 }
 0x2f6   :  { %1014 = vmatprep.subr.bf16.mxu1 %v1187_v0 }
 0x2f9   :  { %1016 = vmatpush3.bf16.msra.mxu1 %v1015_v20 }
 0x2fa   :  { %1017 = vmatprep.subr.bf16.mxu1 %v1187_v0 }
 0x2fd   :  { %1019 = vmatpush3.bf16.msra.mxu1 %v1018_v22 }
 0x2fe   :  { %1020 = vmatprep.subr.bf16.mxu1 %v1187_v0 }
 0x301   :  { %1022 = vmatpush3.bf16.msra.mxu1 %v1021_v25 }
 0x302   :  { %1023 = vmatprep.subr.bf16.mxu1 %v1187_v0 }
 0x305   :  { %1025 = vmatpush3.bf16.msra.mxu1 %v1024_v32 }
 0x306   :  { %1026 = vmatprep.subr.bf16.mxu1 %v1187_v0 }
 0x309   :  { %1028 = vmatpush3.bf16.msra.mxu1 %v1027_v35 }
 0x3bf   :  { %v440_v26 = vpop.f32.mrb[2].mxu1 }
 0x3c0   :  { %v441_v27 = vadd.f32 %v630_v60, %v440_v26  ;;  %v835_v28 = vpop.f32.mrb[3].mxu1 }
 0x3c2   :  { %v444_v29 = vmax.f32 %v441_v27, 0.0 }
 0x3c4   :  { %869 = vmatmul.mubr.f32.vlgmr.msra.gmra.mrb[4].mxu0 %v444_v29 }
 0x497   :  { %v511_v36 = vpop.f32.mrb[4].mxu0 }
 0x498   :  { %v512_v37 = vadd.f32 %v631_v3, %v511_v36  ;;  %v870_v38 = vpop.f32.mrb[5].mxu0 }
 0x49a   :  { %v515_v39 = vmax.f32 %v512_v37, 0.0 }
 0x49c   :  { %v516_v40 = vadd.f32 %v515_v39, %v373_v8 }
 0x49e   :  { %904 = vmatmul.mubr.f32.vlgmr.msra.gmra.mrb[4].mxu1 %v516_v40 }
 0x571   :  { %v606_v42 = vpop.f32.mrb[4].mxu1 }
 0x572   :  { %v607_v43 = vadd.f32 %v632_v41, %v606_v42  ;;  %v905_v44 = vpop.f32.mrb[5].mxu1 }
 0x574   :  { %610 = vst [vmem:[#allocation11] sm:$0xff] %v607_v43 }
 0x575   :  { %1161 = shalt.err (!%p1158_p2)
}
 0x576   :  { %s1162_s10 = scalar_lea.hbm %s1432_s9, 128 }
 0x577   :  { %p1163_p3 = scmp.ne.s32.totalorder %s1432_s9, %s1162_s10  ;;  %p1166_p4 = scmp.lt.u32.totalorder %s1162_s10, %s1432_s9 }
 0x579   :  { %p1168_p5 = pnand %p1166_p4, %p1163_p3 }
 0x57b   :  { %1171 = shalt.err (!%p1168_p5)
}
 0x57c   :  { %620 = dma.vmem_to_hbm [thread:$0]  %s618_s11, 128, %s1432_s9, [#allocation4]  }
 0x57d   :  { %1178 = dma.done.wait [#allocation4], 128  }
 0x57e   :  { %1179 = vsyncadd [#allocation4], 4294967168 }
 0x57f   :  { %624 = vsyncpa [#allocation3], 1 }
 0x580   :  { %625 = vsyncpa [#allocation6], 1 }
 0x581   :  { %626 = vsyncpa [#allocation9], 1 }
 0x582   :  { %627 = vsyncpa [#allocation4], 1 }

</bundles_post_ra>
